<compile_context>
chip_gen: v6e
topology: v6e:2x2x1
jax: 0.10.0
libtpu: 0.0.40
codegen_flags: <defaults>
</compile_context>

<pallas_src>
import jax
import jax.numpy as jnp
from jax.experimental import pallas as pl
from jax.experimental.pallas import tpu as pltpu

LANE = 128
H1 = 64          # width of fc_E1 / fc_F1 and of fc1's output (fixed by the module)


def _round_up(x, m):
    return ((x + m - 1) // m) * m


def mlp_model2_kernel(data_ref, w_in_ref, b_in_ref, w1_ref, b1_ref,
                      w2_ref, b2_ref, out_ref):
    # Stage 1: fc_E1 | fc_F1 + concat.  K=2, so unroll it on the VPU:
    # w_in col 0 holds w_E in rows [0,64) (zeros elsewhere), col 1 holds w_F in
    # rows [64,128).  Result is the 128-sublane slab x_all_t = (128, T).
    e = data_ref[0:1, :]                                   # (1, T)
    f = data_ref[1:2, :]                                   # (1, T)
    x_all = jnp.maximum(
        w_in_ref[:, 0:1] * e + w_in_ref[:, 1:2] * f + b_in_ref[...], 0.0)

    # Stage 2: fc1 + relu  ->  (64, T); MXU with K=128, N=T (well filled).
    h = jnp.maximum(
        jnp.dot(w1_ref[...], x_all, preferred_element_type=jnp.float32)
        + b1_ref[...], 0.0)

    # Stage 3: fc2 (output rows zero-padded to 8)  ->  lane-dense (8, T) store.
    out = jnp.dot(w2_ref[...], h, preferred_element_type=jnp.float32) + b2_ref[...]
    out_ref[...] = out.astype(out_ref.dtype)


def mlp_model2_forward(data, params, *, max_tile_n=4096):
    n, input_dim = data.shape
    assert input_dim >= 2, "MLPModel2 reads data[:, 0] and data[:, 1]"
    output_dim = params["b2"].shape[0]
    out_rows = _round_up(output_dim, 8)                    # sublane-aligned output rows

    # Batch tile: power-of-two bucketed (bounded recompiles across batch sizes),
    # capped at max_tile_n, and ~n/2 so the parallel grid axis has >=2 steps on
    # v7x whenever the batch is large enough to shard.
    tile_n = min(max_tile_n, max(LANE, pl.next_power_of_2(pl.cdiv(n, 2))))
    n_pad = _round_up(n, tile_n)

    # Transposed data (input_dim, n); only the batch axis is padded, and only if needed.
    data_t = data.T.astype(jnp.float32)
    if n_pad != n:
        data_t = jnp.pad(data_t, ((0, 0), (0, n_pad - n)))

    # --- pack the two Linear(1,64) layers + concat into one (128, 2) weight ---
    f32 = jnp.float32
    w_in = jnp.zeros((2 * H1, 2), f32)
    w_in = w_in.at[:H1, 0].set(params["w_E"].reshape(H1))  # E neurons <- data row 0
    w_in = w_in.at[H1:, 1].set(params["w_F"].reshape(H1))  # F neurons <- data row 1
    b_in = jnp.concatenate([params["b_E"], params["b_F"]]).reshape(2 * H1, 1)

    w1 = params["w1"].astype(f32)                          # (64, 128): used as-is (W1 @ x_t)
    b1 = params["b1"].reshape(H1, 1).astype(f32)
    w2p = jnp.zeros((out_rows, H1), f32).at[:output_dim, :].set(params["w2"])
    b2p = jnp.zeros((out_rows, 1), f32).at[:output_dim, 0].set(params["b2"])

    grid = (n_pad // tile_n,)
    out_t = pl.pallas_call(
        mlp_model2_kernel,
        out_shape=jax.ShapeDtypeStruct((out_rows, n_pad), jnp.float32),
        grid=grid,
        in_specs=[
            pl.BlockSpec((input_dim, tile_n), lambda i: (0, i)),   # data tile (pipelined)
            pl.BlockSpec((2 * H1, 2), lambda i: (0, 0)),           # packed fc_E1|fc_F1 weight
            pl.BlockSpec((2 * H1, 1), lambda i: (0, 0)),           # packed biases
            pl.BlockSpec((H1, 2 * H1), lambda i: (0, 0)),          # fc1 weight
            pl.BlockSpec((H1, 1), lambda i: (0, 0)),               # fc1 bias
            pl.BlockSpec((out_rows, H1), lambda i: (0, 0)),        # fc2 weight (row-padded)
            pl.BlockSpec((out_rows, 1), lambda i: (0, 0)),         # fc2 bias (row-padded)
        ],
        out_specs=pl.BlockSpec((out_rows, tile_n), lambda i: (0, i)),
        compiler_params=pltpu.CompilerParams(
            dimension_semantics=("parallel",),
            vmem_limit_bytes=32 * 1024 * 1024),
    )(data_t, w_in, b_in, w1, b1, w2p, b2p)

    # Tiny (out_rows, n) slab -> (n, output_dim)
    return out_t[:output_dim, :n].T


def init_params(key, output_dim):
    ks = jax.random.split(key, 8)
    f32 = jnp.float32
    return {
        # PyTorch layouts: Linear(in, out).weight is (out, in)
        "w_E": 0.3 * jax.random.normal(ks[0], (H1, 1), f32),
        "b_E": 0.1 * jax.random.normal(ks[1], (H1,), f32),
        "w_F": 0.3 * jax.random.normal(ks[2], (H1, 1), f32),
        "b_F": 0.1 * jax.random.normal(ks[3], (H1,), f32),
        "w1":  0.3 * jax.random.normal(ks[4], (H1, 2 * H1), f32),
        "b1":  0.1 * jax.random.normal(ks[5], (H1,), f32),
        "w2":  0.3 * jax.random.normal(ks[6], (output_dim, H1), f32),
        "b2":  0.1 * jax.random.normal(ks[7], (output_dim,), f32),
    }


def ref_forward(data, p):
    """Pure-JAX reference mirroring the PyTorch MLPModel2 forward."""
    E = data[:, 0:1]
    F = data[:, 1:2]
    x_E1 = jnp.maximum(E @ p["w_E"].T + p["b_E"], 0.0)
    x_F1 = jnp.maximum(F @ p["w_F"].T + p["b_F"], 0.0)
    x_all = jnp.concatenate([x_E1, x_F1], axis=1)
    x = jnp.maximum(x_all @ p["w1"].T + p["b1"], 0.0)
    return x @ p["w2"].T + p["b2"]


if __name__ == "__main__":
    batch, input_dim, output_dim = 8, 2, 3
    key = jax.random.PRNGKey(0)
    kp, kx = jax.random.split(key)
    params = init_params(kp, output_dim)
    data = jax.random.normal(kx, (batch, input_dim), jnp.float32)

    out = jax.block_until_ready(mlp_model2_forward(data, params))
    ref = ref_forward(data, params)

    assert out.shape == (batch, output_dim)
    if not bool(jnp.allclose(out, ref, atol=1e-4, rtol=1e-4)):
        raise AssertionError("Pallas kernel does not match JAX reference")
    print("KERNEL_OK")
</pallas_src>

<mosaic_0001>
module attributes {stable_mosaic.version = 11 : i64} {
  func.func @mlp_model2_kernel(%arg0: i32, %arg1: memref<2x128xf32, #tpu.memory_space<vmem>>, %arg2: memref<128x2xf32, #tpu.memory_space<vmem>>, %arg3: memref<128x1xf32, #tpu.memory_space<vmem>>, %arg4: memref<64x128xf32, #tpu.memory_space<vmem>>, %arg5: memref<64x1xf32, #tpu.memory_space<vmem>>, %arg6: memref<8x64xf32, #tpu.memory_space<vmem>>, %arg7: memref<8x1xf32, #tpu.memory_space<vmem>>, %arg8: memref<8x128xf32, #tpu.memory_space<vmem>>) attributes {dimension_semantics = [#tpu.dimension_semantics<parallel>], iteration_bounds = array<i64: 1>, scalar_prefetch = 0 : i64, scratch_operands = 0 : i64, tpu.core_type = #tpu.core_type<tc>, window_params = [{transform_indices = @transform_0, window_bounds = array<i64: 2, 128>}, {pipeline_mode = #tpu.pipeline_mode<synchronous>, transform_indices = @transform_1, window_bounds = array<i64: 128, 2>}, {pipeline_mode = #tpu.pipeline_mode<synchronous>, transform_indices = @transform_2, window_bounds = array<i64: 128, 1>}, {pipeline_mode = #tpu.pipeline_mode<synchronous>, transform_indices = @transform_3, window_bounds = array<i64: 64, 128>}, {pipeline_mode = #tpu.pipeline_mode<synchronous>, transform_indices = @transform_4, window_bounds = array<i64: 64, 1>}, {pipeline_mode = #tpu.pipeline_mode<synchronous>, transform_indices = @transform_5, window_bounds = array<i64: 8, 64>}, {pipeline_mode = #tpu.pipeline_mode<synchronous>, transform_indices = @transform_6, window_bounds = array<i64: 8, 1>}, {transform_indices = @transform_7, window_bounds = array<i64: 8, 128>}]} {
    %c0 = arith.constant 0 : index
    %c0_0 = arith.constant 0 : index
    %0 = vector.load %arg1[%c0, %c0_0] : memref<2x128xf32, #tpu.memory_space<vmem>>, vector<1x128xf32>
    %c1 = arith.constant 1 : index
    %c0_1 = arith.constant 0 : index
    %1 = vector.load %arg1[%c1, %c0_1] : memref<2x128xf32, #tpu.memory_space<vmem>>, vector<1x128xf32>
    %c0_2 = arith.constant 0 : index
    %c0_3 = arith.constant 0 : index
    %2 = vector.load %arg2[%c0_2, %c0_3] : memref<128x2xf32, #tpu.memory_space<vmem>>, vector<128x1xf32>
    %3 = vector.broadcast %2 : vector<128x1xf32> to vector<128x128xf32>
    %4 = vector.broadcast %0 : vector<1x128xf32> to vector<128x128xf32>
    %5 = arith.mulf %3, %4 : vector<128x128xf32>
    %c0_4 = arith.constant 0 : index
    %c1_5 = arith.constant 1 : index
    %6 = vector.load %arg2[%c0_4, %c1_5] : memref<128x2xf32, #tpu.memory_space<vmem>>, vector<128x1xf32>
    %7 = vector.broadcast %6 : vector<128x1xf32> to vector<128x128xf32>
    %8 = vector.broadcast %1 : vector<1x128xf32> to vector<128x128xf32>
    %9 = arith.mulf %7, %8 : vector<128x128xf32>
    %10 = arith.addf %5, %9 : vector<128x128xf32>
    %c0_6 = arith.constant 0 : index
    %c0_7 = arith.constant 0 : index
    %11 = vector.load %arg3[%c0_6, %c0_7] : memref<128x1xf32, #tpu.memory_space<vmem>>, vector<128x1xf32>
    %12 = vector.broadcast %11 : vector<128x1xf32> to vector<128x128xf32>
    %13 = arith.addf %10, %12 : vector<128x128xf32>
    %cst = arith.constant 0.000000e+00 : f32
    %14 = vector.broadcast %cst : f32 to vector<128x128xf32>
    %15 = arith.maximumf %13, %14 : vector<128x128xf32>
    %c0_8 = arith.constant 0 : index
    %c0_9 = arith.constant 0 : index
    %16 = vector.load %arg4[%c0_8, %c0_9] : memref<64x128xf32, #tpu.memory_space<vmem>>, vector<64x128xf32>
    %cst_10 = arith.constant dense<0.000000e+00> : vector<64x128xf32>
    %17 = tpu.matmul %16, %15, %cst_10 {dimension_numbers = #tpu.dot_dimension_numbers<[1], [0], [0], [1], [0, 0, 1, 1], [], []>} : vector<64x128xf32>, vector<128x128xf32>, vector<64x128xf32> -> vector<64x128xf32>
    %c0_11 = arith.constant 0 : index
    %c0_12 = arith.constant 0 : index
    %18 = vector.load %arg5[%c0_11, %c0_12] : memref<64x1xf32, #tpu.memory_space<vmem>>, vector<64x1xf32>
    %19 = vector.broadcast %18 : vector<64x1xf32> to vector<64x128xf32>
    %20 = arith.addf %17, %19 : vector<64x128xf32>
    %cst_13 = arith.constant 0.000000e+00 : f32
    %21 = vector.broadcast %cst_13 : f32 to vector<64x128xf32>
    %22 = arith.maximumf %20, %21 : vector<64x128xf32>
    %c0_14 = arith.constant 0 : index
    %c0_15 = arith.constant 0 : index
    %23 = vector.load %arg6[%c0_14, %c0_15] : memref<8x64xf32, #tpu.memory_space<vmem>>, vector<8x64xf32>
    %cst_16 = arith.constant dense<0.000000e+00> : vector<8x128xf32>
    %24 = tpu.matmul %23, %22, %cst_16 {dimension_numbers = #tpu.dot_dimension_numbers<[1], [0], [0], [1], [0, 0, 1, 1], [], []>} : vector<8x64xf32>, vector<64x128xf32>, vector<8x128xf32> -> vector<8x128xf32>
    %c0_17 = arith.constant 0 : index
    %c0_18 = arith.constant 0 : index
    %25 = vector.load %arg7[%c0_17, %c0_18] : memref<8x1xf32, #tpu.memory_space<vmem>>, vector<8x1xf32>
    %26 = vector.broadcast %25 : vector<8x1xf32> to vector<8x128xf32>
    %27 = arith.addf %24, %26 : vector<8x128xf32>
    %c0_19 = arith.constant 0 : index
    %c0_20 = arith.constant 0 : index
    %28 = vector.load %arg8[%c0_19, %c0_20] : memref<8x128xf32, #tpu.memory_space<vmem>>, vector<8x128xf32>
    tpu.vector_store %arg8[%c0_19, %c0_20], %27 {strides = array<i32>} : memref<8x128xf32, #tpu.memory_space<vmem>>, vector<8x128xf32>,
    return
  }
  func.func @transform_0(%arg0: i32) -> (i32, i32) {
    %c0_i32 = arith.constant 0 : i32
    %c0_i32_0 = arith.constant 0 : i32
    return %c0_i32, %arg0 : i32, i32
  }
  func.func @transform_1(%arg0: i32) -> (i32, i32) {
    %c0_i32 = arith.constant 0 : i32
    %c0_i32_0 = arith.constant 0 : i32
    %c0_i32_1 = arith.constant 0 : i32
    return %c0_i32, %c0_i32_0 : i32, i32
  }
  func.func @transform_2(%arg0: i32) -> (i32, i32) {
    %c0_i32 = arith.constant 0 : i32
    %c0_i32_0 = arith.constant 0 : i32
    %c0_i32_1 = arith.constant 0 : i32
    return %c0_i32, %c0_i32_0 : i32, i32
  }
  func.func @transform_3(%arg0: i32) -> (i32, i32) {
    %c0_i32 = arith.constant 0 : i32
    %c0_i32_0 = arith.constant 0 : i32
    %c0_i32_1 = arith.constant 0 : i32
    return %c0_i32, %c0_i32_0 : i32, i32
  }
  func.func @transform_4(%arg0: i32) -> (i32, i32) {
    %c0_i32 = arith.constant 0 : i32
    %c0_i32_0 = arith.constant 0 : i32
    %c0_i32_1 = arith.constant 0 : i32
    return %c0_i32, %c0_i32_0 : i32, i32
  }
  func.func @transform_5(%arg0: i32) -> (i32, i32) {
    %c0_i32 = arith.constant 0 : i32
    %c0_i32_0 = arith.constant 0 : i32
    %c0_i32_1 = arith.constant 0 : i32
    return %c0_i32, %c0_i32_0 : i32, i32
  }
  func.func @transform_6(%arg0: i32) -> (i32, i32) {
    %c0_i32 = arith.constant 0 : i32
    %c0_i32_0 = arith.constant 0 : i32
    %c0_i32_1 = arith.constant 0 : i32
    return %c0_i32, %c0_i32_0 : i32, i32
  }
  func.func @transform_7(%arg0: i32) -> (i32, i32) {
    %c0_i32 = arith.constant 0 : i32
    %c0_i32_0 = arith.constant 0 : i32
    return %c0_i32, %arg0 : i32, i32
  }
}

</mosaic_0001>

<bundles_post_ra>
// kernel: tpu_custom_call.1
= control target key start
LH: loop header
LB: loop body
LE: loop exit
PB: predicated region body
PF: predicated region fallthrough
CT: control target
= control target key end

     0   :  { %v783_v2 = vmov 1   ;;  %v784_v3 = vmov 0   ;;  %s1062_s0 = inlined_call_operand.vmem [shape: f32[2,128], index: 0, kind: input, shape index: {}]   ;;  %s1063_s1 = inlined_call_operand.vmem [shape: f32[128,2], index: 1, kind: input, shape index: {}]   ;;  %s1064_s2 = inlined_call_operand.vmem [shape: f32[128,1], index: 2, kind: input, shape index: {}]   ;;  %s1065_s3 = inlined_call_operand.vmem [shape: f32[64,128], index: 3, kind: input, shape index: {}]   ;;  %s1066_s4 = inlined_call_operand.vmem [shape: f32[64,1], index: 4, kind: input, shape index: {}]   ;;  %s1067_s5 = inlined_call_operand.vmem [shape: f32[8,64], index: 5, kind: input, shape index: {}]   ;;  %s1068_s6 = inlined_call_operand.vmem [shape: f32[8,1], index: 6, kind: input, shape index: {}]   ;;  %s1069_s7 = inlined_call_operand.hbm [shape: f32[8,128], index: 7, kind: output, shape index: {}]  }
   0x1   :  { %v44_v0 = vld [vmem:[%s1063_s1 + $0x78] sm:$0xff]  ;;  %v43_v1 = vld [vmem:[%s1063_s1 + $0x70] sm:$0xff]  ;;  %742 = vset.pattern.permute.xlu0 %v783_v2  ;;  %743 = vset.pattern.permute.xlu1 %v784_v3  ;;  %v42_v4 = vld [vmem:[%s1063_s1 + $0x68] sm:$0xff] }
   0x2   :  { %206 = vperm.xlu0 %742, %v44_v0   ;;  %117 = vperm.xlu1 %743, %v43_v1   ;;  %v39_v5 = vld [vmem:[%s1063_s1 + $0x50] sm:$0xff]  ;;  %v38_v6 = vld [vmem:[%s1063_s1 + $0x48] sm:$0xff]  ;;  %v260_v7 = vld [vmem:[%s1064_s2 + $0x78] sm:$0xff] }
   0x6   :  { %744 = vset.pattern.permute.xlu1 %v783_v2  ;;  %198 = vperm.xlu0 %742, %v42_v4  }
   0x7   :  { %202 = vperm.xlu1 %744, %v43_v1  }
   0xa   :  { %186 = vperm.xlu0 %742, %v39_v5  }
   0xb   :  { %745 = vset.pattern.permute.xlu1 %v784_v3 }
   0xc   :  { %112 = vperm.xlu1 %745, %v42_v4  }
   0xe   :  { %182 = vperm.xlu0 %742, %v38_v6  }
   0xf   :  { %12 = vsyncpa [#allocation3], 0  ;;  %v35_v8 = vld [vmem:[%s1063_s1 + $0x30] sm:$0xff]  ;;  %v41_v9 = vld [vmem:[%s1063_s1 + $0x60] sm:$0xff]  ;;  %vm786_vm0 = vmmov 0   ;;  %vm549_vm1 = vcmask 523264  }
  0x10   :  { %338 = vperm.xlu1 %745, %v260_v7   ;;  %v34_v10 = vld [vmem:[%s1063_s1 + $0x28] sm:$0xff]  ;;  %v259_v11 = vld [vmem:[%s1064_s2 + $0x70] sm:$0xff]  ;;  %v40_v14 = vld [vmem:[%s1063_s1 + $0x58] sm:$0xff]  ;;  %s787_s28 = smov [#allocation2]  }
  0x11   :  { %v866_v12 = vld [vmem:[%s1063_s1 + $0x10] sm:$0xff]  ;;  %v873_v13 = vld [vmem:[%s1063_s1 + $0x8] sm:$0xff]  ;;  %v257_v15 = vld [vmem:[%s1064_s2 + $0x60] sm:$0xff]  ;;  %s630_s29 = sshll.u32 %s787_s28, 4  ;;  %s631_s29 = int_to_ptr.vmem [resolvable:$true] %s630_s29 }
  0x12   :  { %170 = vperm.xlu0 %742, %v35_v8   ;;  %v258_v16 = vld [vmem:[%s1064_s2 + $0x68] sm:$0xff]  ;;  %v256_v17 = vld [vmem:[%s1064_s2 + $0x58] sm:$0xff]  ;;  %v37_v18 = vld [vmem:[%s1063_s1 + $0x40] sm:$0xff]  ;;  %s761_s30 = scalar_lea.vmem %s631_s29, 128  ;;  %p766_p1 = scmp.lt.s32.totalorder %s631_s29, %s631_s29 }
  0x13   :  { %v36_v19 = vld [vmem:[%s1063_s1 + $0x38] sm:$0xff]  ;;  %v255_v20 = vld [vmem:[%s1064_s2 + $0x50] sm:$0xff]  ;;  %v254_v21 = vld [vmem:[%s1064_s2 + $0x48] sm:$0xff]  ;;  %p762_p0 = scmp.ne.s32.totalorder %s631_s29, %s761_s30  ;;  %p767_p2 = scmp.lt.s32.totalorder %s761_s30, %s761_s30 }
  0x14   :  { %746 = vset.pattern.permute.xlu1 %v783_v2  ;;  %v33_v22 = vld [vmem:[%s1063_s1 + $0x20] sm:$0xff]  ;;  %v32_v23 = vld [vmem:[%s1063_s1 + $0x18] sm:$0xff]  ;;  %v250_v24 = vld [vmem:[%s1064_s2 + $0x28] sm:$0xff] }
  0x15   :  { %194 = vperm.xlu1 %746, %v41_v9   ;;  %v253_v25 = vld [vmem:[%s1064_s2 + $0x40] sm:$0xff]  ;;  %v246_v27 = vld [vmem:[%s1064_s2 + $0x8] sm:$0xff]  ;;  %v252_v28 = vld [vmem:[%s1064_s2 + $0x38] sm:$0xff]  ;;  %p768_p3 = por %p767_p2, %p766_p1 }
  0x16   :  { %166 = vperm.xlu0 %742, %v34_v10   ;;  %v29_v26 = vld [vmem:[%s1063_s1] sm:$0xff]  ;;  %v388_v29 = vld [vmem:[%s1066_s4 + $0x38] sm:$0xff]  ;;  %v386_v30 = vld [vmem:[%s1066_s4 + $0x28] sm:$0xff] }
  0x17   :  { %v251_v31 = vld [vmem:[%s1064_s2 + $0x30] sm:$0xff]  ;;  %v384_v32 = vld [vmem:[%s1066_s4 + $0x18] sm:$0xff]  ;;  %v382_v33 = vld [vmem:[%s1066_s4 + $0x8] sm:$0xff]  ;;  %p769_p4 = pnand %p768_p3, %p762_p0 }
  0x18   :  { %v543_v34 = vld [vmem:[%s1068_s6] sm:$0xff]  ;;  %v248_v36 = vld [vmem:[%s1064_s2 + $0x18] sm:$0xff]  ;;  %v247_v37 = vld [vmem:[%s1064_s2 + $0x10] sm:$0xff] }
  0x19   :  { %747 = vset.pattern.permute.xlu1 %v784_v3  ;;  %v249_v35 = vld [vmem:[%s1064_s2 + $0x20] sm:$0xff]  ;;  %v387_v42 = vld [vmem:[%s1066_s4 + $0x30] sm:$0xff] }
  0x1a   :  { %333 = vperm.xlu1 %747, %v259_v11   ;;  %154 = vperm.xlu0 %742, %v866_v12   ;;  %v245_v38 = vld [vmem:[%s1064_s2] sm:$0xff]  ;;  %v383_v48 = vld [vmem:[%s1066_s4 + $0x10] sm:$0xff] }
  0x1b   :  { %v373_v41 = vld [vmem:[%s1065_s3] sm:$0xff] }
  0x1c   :  { %706 = vmatprep.mubr.f32.mxu0 %v373_v41  ;;  %v385_v45 = vld [vmem:[%s1066_s4 + $0x20] sm:$0xff] }
  0x1d   :  { %v381_v51 = vld [vmem:[%s1066_s4] sm:$0xff] }
  0x1e   :  { %748 = vset.pattern.permute.xlu1 %v783_v2  ;;  %150 = vperm.xlu0 %742, %v873_v13   ;;  %v992_v58 = vld [vmem:[%s1062_s0 + $0x1] ss:$0 sm:$0xff]  ;;  %v997_v60 = vld [vmem:[%s1062_s0] ss:$0 sm:$0xff] }
  0x1f   :  { %190 = vperm.xlu1 %748, %v40_v14  }
  0x22   :  { %758 = vset.pattern.permute.xlu0 %v784_v3 }
  0x23   :  { %749 = vset.pattern.permute.xlu1 %v784_v3  ;;  %122 = vperm.xlu0 %758, %v44_v0  }
  0x24   :  { %97 = vperm.xlu1 %749, %v39_v5  }
  0x27   :  { %107 = vperm.xlu0 %758, %v41_v9  }
  0x28   :  { %323 = vperm.xlu1 %749, %v257_v15  }
  0x2b   :  { %102 = vperm.xlu0 %758, %v40_v14  }
  0x2c   :  { %92 = vperm.xlu1 %749, %v38_v6  }
  0x2f   :  { %328 = vperm.xlu0 %758, %v258_v16  }
  0x30   :  { %318 = vperm.xlu1 %749, %v256_v17  }
  0x33   :  { %87 = vperm.xlu0 %758, %v37_v18  }
  0x34   :  { %750 = vset.pattern.permute.xlu1 %v783_v2 }
  0x35   :  { %178 = vperm.xlu1 %750, %v37_v18  }
  0x37   :  { %82 = vperm.xlu0 %758, %v36_v19  }
  0x39   :  { %751 = vset.pattern.permute.xlu1 %v784_v3 }
  0x3a   :  { %313 = vperm.xlu1 %751, %v255_v20  }
  0x3b   :  { %308 = vperm.xlu0 %758, %v254_v21  }
  0x3e   :  { %752 = vset.pattern.permute.xlu1 %v783_v2 }
  0x3f   :  { %174 = vperm.xlu1 %752, %v36_v19   ;;  %67 = vperm.xlu0 %758, %v33_v22  }
  0x43   :  { %753 = vset.pattern.permute.xlu1 %v784_v3  ;;  %62 = vperm.xlu0 %758, %v32_v23  }
  0x44   :  { %77 = vperm.xlu1 %753, %v35_v8  }
  0x47   :  { %288 = vperm.xlu0 %758, %v250_v24  }
  0x48   :  { %303 = vperm.xlu1 %753, %v253_v25  }
  0x4b   :  { %47 = vperm.xlu0 %758, %v29_v26  }
  0x4c   :  { %72 = vperm.xlu1 %753, %v34_v10  }
  0x4f   :  { %268 = vperm.xlu0 %758, %v246_v27  }
  0x50   :  { %298 = vperm.xlu1 %753, %v252_v28  }
  0x53   :  { %426 = vperm.xlu0 %758, %v388_v29  }
  0x54   :  { %754 = vset.pattern.permute.xlu1 %v783_v2 }
  0x55   :  { %162 = vperm.xlu1 %754, %v33_v22  }
  0x57   :  { %416 = vperm.xlu0 %758, %v386_v30  }
  0x59   :  { %755 = vset.pattern.permute.xlu1 %v784_v3 }
  0x5a   :  { %293 = vperm.xlu1 %755, %v251_v31  }
  0x5b   :  { %406 = vperm.xlu0 %758, %v384_v32  }
  0x5e   :  { %756 = vset.pattern.permute.xlu1 %v783_v2 }
  0x5f   :  { %158 = vperm.xlu1 %756, %v32_v23   ;;  %396 = vperm.xlu0 %758, %v382_v33  }
  0x63   :  { %757 = vset.pattern.permute.xlu1 %v784_v3  ;;  %546 = vperm.xlu0 %758, %v543_v34  }
  0x64   :  { %57 = vperm.xlu1 %757, %v866_v12  }
  0x68   :  { %283 = vperm.xlu1 %757, %v249_v35  }
  0x6c   :  { %52 = vperm.xlu1 %757, %v873_v13  }
  0x70   :  { %278 = vperm.xlu1 %757, %v248_v36  }
  0x74   :  { %759 = vset.pattern.permute.xlu1 %v783_v2 }
  0x75   :  { %146 = vperm.xlu1 %759, %v29_v26  }
  0x79   :  { %760 = vset.pattern.permute.xlu1 %v784_v3 }
  0x7a   :  { %273 = vperm.xlu1 %760, %v247_v37  }
  0x7d   :  { %v118_v39 = vpop.permute.xlu1 %117  ;;  %v207_v40 = vpop.permute.xlu0 %206 }
  0x7e   :  { %263 = vperm.xlu1 %760, %v245_v38   ;;  %v228_v61 = vmul.f32 %v992_v58, %v207_v40  ;;  %v143_v0 = vmul.f32 %v997_v60, %v118_v39 }
  0x81   :  { %v199_v43 = vpop.permute.xlu0 %198 }
  0x82   :  { %v203_v44 = vpop.permute.xlu1 %202  ;;  %421 = vperm.xlu1 %760, %v387_v42   ;;  %v226_v10 = vmul.f32 %v992_v58, %v199_v43 }
  0x83   :  { %v227_v62 = vmul.f32 %v992_v58, %v203_v44 }
  0x85   :  { %v187_v46 = vpop.permute.xlu0 %186  ;;  %v243_v3 = vadd.f32 %v227_v62, %v143_v0 }
  0x86   :  { %411 = vperm.xlu1 %760, %v385_v45   ;;  %v223_v30 = vmul.f32 %v992_v58, %v187_v46 }
  0x87   :  { %v113_v47 = vpop.permute.xlu1 %112 }
  0x88   :  { %v142_v11 = vmul.f32 %v997_v60, %v113_v47 }
  0x89   :  { %v183_v49 = vpop.permute.xlu0 %182 }
  0x8a   :  { %401 = vperm.xlu1 %760, %v383_v48   ;;  %v242_v20 = vadd.f32 %v226_v10, %v142_v11  ;;  %v222_v33 = vmul.f32 %v992_v58, %v183_v49 }
  0x8b   :  { %v339_v50 = vpop.permute.xlu1 %338 }
  0x8d   :  { %v981_v52 = vpop.permute.xlu0 %170 }
  0x8e   :  { %391 = vperm.xlu1 %760, %v381_v51  }
  0x90   :  { %v195_v53 = vpop.permute.xlu1 %194 }
  0x91   :  { %v983_v54 = vpop.permute.xlu0 %166  ;;  %v225_v12 = vmul.f32 %v992_v58, %v195_v53 }
  0x95   :  { %v334_v55 = vpop.permute.xlu1 %333  ;;  %v985_v56 = vpop.permute.xlu0 %154 }
  0x96   :  { %v355_v6 = vadd.f32 %v334_v55, %v243_v3 }
  0x98   :  { %v371_v15 = vmax.f32 %v355_v6, 0.0 }
  0x99   :  { %v987_v57 = vpop.permute.xlu0 %150 }
  0x9a   :  { %v191_v59 = vpop.permute.xlu1 %190 }
  0x9b   :  { %v224_v16 = vmul.f32 %v992_v58, %v191_v59 }
  0x9e   :  { %v123_v63 = vpop.permute.xlu0 %122 }
  0x9f   :  { %v144_v1 = vmul.f32 %v997_v60, %v123_v63  ;;  %v98_v2 = vpop.permute.xlu1 %97 }
  0xa0   :  { %v139_v31 = vmul.f32 %v997_v60, %v98_v2 }
  0xa1   :  { %v244_v4 = vadd.f32 %v228_v61, %v144_v1 }
  0xa2   :  { %v108_v5 = vpop.permute.xlu0 %107  ;;  %v239_v37 = vadd.f32 %v223_v30, %v139_v31 }
  0xa3   :  { %v141_v7 = vmul.f32 %v997_v60, %v108_v5  ;;  %v324_v8 = vpop.permute.xlu1 %323  ;;  %v356_v9 = vadd.f32 %v339_v50, %v244_v4  ;;  %v218_v5 = vmul.f32 %v992_v58, %v983_v54 }
  0xa5   :  { %v372_v13 = vmax.f32 %v356_v9, 0.0  ;;  %v241_v17 = vadd.f32 %v225_v12, %v141_v7 }
  0xa6   :  { %v103_v14 = vpop.permute.xlu0 %102 }
  0xa7   :  { %v140_v18 = vmul.f32 %v997_v60, %v103_v14  ;;  %v93_v19 = vpop.permute.xlu1 %92  ;;  %674 = vmatprep.subr.mxu0 %v372_v13  ;;  %v353_v23 = vadd.f32 %v324_v8, %v241_v17  ;;  %v219_v8 = vmul.f32 %v992_v58, %v981_v52 }
  0xa8   :  { %675 = vmatpush3.msra.mxu0 %v372_v13  ;;  %v138_v34 = vmul.f32 %v997_v60, %v93_v19 }
  0xa9   :  { %676 = vmatprep.subr.mxu0 %v371_v15  ;;  %v240_v21 = vadd.f32 %v224_v16, %v140_v18  ;;  %v369_v29 = vmax.f32 %v353_v23, 0.0 }
  0xaa   :  { %v329_v22 = vpop.permute.xlu0 %328  ;;  %677 = vmatpush3.msra.mxu0 %v371_v15  ;;  %v238_v39 = vadd.f32 %v222_v33, %v138_v34 }
  0xab   :  { %v354_v24 = vadd.f32 %v329_v22, %v242_v20  ;;  %v319_v25 = vpop.permute.xlu1 %318 }
  0xac   :  { %v352_v27 = vadd.f32 %v319_v25, %v240_v21 }
  0xad   :  { %v370_v26 = vmax.f32 %v354_v24, 0.0 }
  0xae   :  { %v88_v28 = vpop.permute.xlu0 %87  ;;  %v368_v35 = vmax.f32 %v352_v27, 0.0 }
  0xaf   :  { %678 = vmatprep.subr.mxu0 %v370_v26  ;;  %v137_v46 = vmul.f32 %v997_v60, %v88_v28 }
  0xb0   :  { %v179_v32 = vpop.permute.xlu1 %178  ;;  %679 = vmatpush3.msra.mxu0 %v370_v26 }
  0xb1   :  { %680 = vmatprep.subr.mxu0 %v369_v29  ;;  %v221_v47 = vmul.f32 %v992_v58, %v179_v32  ;;  %v214_v32 = vmul.f32 %v992_v58, %v987_v57 }
  0xb2   :  { %v83_v36 = vpop.permute.xlu0 %82  ;;  %681 = vmatpush3.msra.mxu0 %v369_v29 }
  0xb3   :  { %682 = vmatprep.subr.mxu0 %v368_v35  ;;  %v237_v49 = vadd.f32 %v221_v47, %v137_v46  ;;  %v136_v53 = vmul.f32 %v997_v60, %v83_v36 }
  0xb4   :  { %683 = vmatpush3.msra.mxu0 %v368_v35  ;;  %v215_v35 = vmul.f32 %v992_v58, %v985_v56  ;;  %v374_v56 = vld [vmem:[%s1065_s3 + $0x8] sm:$0xff] }
  0xb5   :  { %v314_v38 = vpop.permute.xlu1 %313 }
  0xb6   :  { %v351_v40 = vadd.f32 %v314_v38, %v239_v37  ;;  %v309_v41 = vpop.permute.xlu0 %308 }
  0xb7   :  { %v350_v42 = vadd.f32 %v309_v41, %v238_v39 }
  0xb8   :  { %v367_v43 = vmax.f32 %v351_v40, 0.0 }
  0xb9   :  { %v366_v44 = vmax.f32 %v350_v42, 0.0 }
  0xba   :  { %v175_v45 = vpop.permute.xlu1 %174  ;;  %684 = vmatprep.subr.mxu0 %v367_v43  ;;  %v68_v62 = vpop.permute.xlu0 %67 }
  0xbb   :  { %685 = vmatpush3.msra.mxu0 %v367_v43  ;;  %v220_v55 = vmul.f32 %v992_v58, %v175_v45  ;;  %v133_v19 = vmul.f32 %v997_v60, %v68_v62 }
  0xbc   :  { %686 = vmatprep.subr.mxu0 %v366_v44 }
  0xbd   :  { %687 = vmatpush3.msra.mxu0 %v366_v44  ;;  %v236_v63 = vadd.f32 %v220_v55, %v136_v53  ;;  %v380_v53 = vld [vmem:[%s1065_s3 + $0x38] sm:$0xff]  ;;  %v785_v55 = vmov 0.0  }
  0xbe   :  { %v63_v4 = vpop.permute.xlu0 %62  ;;  %718 = vmatprep.subr.mxu1 %v785_v55  ;;  %734 = vmatprep.mubr.msk.f32.mxu1 %vm786_vm0, %v785_v55 }
  0xbf   :  { %v78_v48 = vpop.permute.xlu1 %77  ;;  %v132_v25 = vmul.f32 %v997_v60, %v63_v4 }
  0xc0   :  { %v135_v6 = vmul.f32 %v997_v60, %v78_v48 }
  0xc2   :  { %v235_v10 = vadd.f32 %v219_v8, %v135_v6  ;;  %v289_v11 = vpop.permute.xlu0 %288 }
  0xc3   :  { %v304_v50 = vpop.permute.xlu1 %303 }
  0xc4   :  { %v349_v51 = vadd.f32 %v304_v50, %v237_v49  ;;  %v377_v49 = vld [vmem:[%s1065_s3 + $0x20] sm:$0xff]  ;;  %v378_v50 = vld [vmem:[%s1065_s3 + $0x28] sm:$0xff] }
  0xc6   :  { %v365_v59 = vmax.f32 %v349_v51, 0.0  ;;  %v48_v31 = vpop.permute.xlu0 %47  ;;  %v379_v51 = vld [vmem:[%s1065_s3 + $0x30] sm:$0xff] }
  0xc7   :  { %v73_v61 = vpop.permute.xlu1 %72  ;;  %v129_v41 = vmul.f32 %v997_v60, %v48_v31 }
  0xc8   :  { %688 = vmatprep.subr.mxu0 %v365_v59  ;;  %v134_v2 = vmul.f32 %v997_v60, %v73_v61 }
  0xc9   :  { %689 = vmatpush3.msra.mxu0 %v365_v59 }
  0xca   :  { %v234_v9 = vadd.f32 %v218_v5, %v134_v2  ;;  %v269_v39 = vpop.permute.xlu0 %268 }
  0xcb   :  { %v299_v0 = vpop.permute.xlu1 %298 }
  0xcc   :  { %v348_v1 = vadd.f32 %v299_v0, %v236_v63  ;;  %v346_v14 = vadd.f32 %v289_v11, %v234_v9 }
  0xce   :  { %v364_v3 = vmax.f32 %v348_v1, 0.0  ;;  %v362_v17 = vmax.f32 %v346_v14, 0.0  ;;  %v427_v62 = vpop.permute.xlu0 %426 }
  0xd0   :  { %v163_v7 = vpop.permute.xlu1 %162  ;;  %690 = vmatprep.subr.mxu0 %v364_v3 }
  0xd1   :  { %691 = vmatpush3.msra.mxu0 %v364_v3  ;;  %v217_v54 = vmul.f32 %v992_v58, %v163_v7 }
  0xd2   :  { %v417_v3 = vpop.permute.xlu0 %416 }
  0xd3   :  { %v233_v20 = vadd.f32 %v217_v54, %v133_v19 }
  0xd5   :  { %v294_v12 = vpop.permute.xlu1 %293 }
  0xd6   :  { %v347_v13 = vadd.f32 %v294_v12, %v235_v10  ;;  %v407_v12 = vpop.permute.xlu0 %406 }
  0xd8   :  { %v363_v15 = vmax.f32 %v347_v13, 0.0 }
  0xda   :  { %v159_v16 = vpop.permute.xlu1 %158  ;;  %692 = vmatprep.subr.mxu0 %v363_v15  ;;  %v397_v19 = vpop.permute.xlu0 %396 }
  0xdb   :  { %693 = vmatpush3.msra.mxu0 %v363_v15  ;;  %v216_v22 = vmul.f32 %v992_v58, %v159_v16 }
  0xdc   :  { %694 = vmatprep.subr.mxu0 %v362_v17 }
  0xdd   :  { %695 = vmatpush3.msra.mxu0 %v362_v17  ;;  %v232_v26 = vadd.f32 %v216_v22, %v132_v25 }
  0xdf   :  { %v58_v18 = vpop.permute.xlu1 %57 }
  0xe0   :  { %v131_v33 = vmul.f32 %v997_v60, %v58_v18 }
  0xe2   :  { %v231_v38 = vadd.f32 %v215_v35, %v131_v33 }
  0xe3   :  { %v284_v52 = vpop.permute.xlu1 %283 }
  0xe4   :  { %v345_v21 = vadd.f32 %v284_v52, %v233_v20 }
  0xe6   :  { %v361_v23 = vmax.f32 %v345_v21, 0.0 }
  0xe7   :  { %v53_v24 = vpop.permute.xlu1 %52 }
  0xe8   :  { %696 = vmatprep.subr.mxu0 %v361_v23  ;;  %v130_v29 = vmul.f32 %v997_v60, %v53_v24  ;;  %v376_v60 = vld [vmem:[%s1065_s3 + $0x18] sm:$0xff] }
  0xe9   :  { %697 = vmatpush3.msra.mxu0 %v361_v23 }
  0xea   :  { %v230_v36 = vadd.f32 %v214_v32, %v130_v29 }
  0xeb   :  { %v279_v27 = vpop.permute.xlu1 %278 }
  0xec   :  { %v344_v28 = vadd.f32 %v279_v27, %v232_v26  ;;  %v342_v43 = vadd.f32 %v269_v39, %v230_v36  ;;  %v542_v26 = vld [vmem:[%s1067_s5] sm:$0xff]  ;;  %v547_v27 = vpop.permute.xlu0 %546 }
  0xee   :  { %v360_v30 = vmax.f32 %v344_v28, 0.0  ;;  %v358_v47 = vmax.f32 %v342_v43, 0.0 }
  0xf0   :  { %v147_v34 = vpop.permute.xlu1 %146  ;;  %698 = vmatprep.subr.mxu0 %v360_v30 }
  0xf1   :  { %699 = vmatpush3.msra.mxu0 %v360_v30  ;;  %v213_v37 = vmul.f32 %v992_v58, %v147_v34  ;;  %v375_v58 = vld [vmem:[%s1065_s3 + $0x10] sm:$0xff] }
  0xf3   :  { %v229_v57 = vadd.f32 %v213_v37, %v129_v41 }
  0xf5   :  { %v274_v40 = vpop.permute.xlu1 %273 }
  0xf6   :  { %v343_v42 = vadd.f32 %v274_v40, %v231_v38 }
  0xf8   :  { %v359_v44 = vmax.f32 %v343_v42, 0.0 }
  0xf9   :  { %v264_v45 = vpop.permute.xlu1 %263 }
  0xfa   :  { %v341_v46 = vadd.f32 %v264_v45, %v229_v57  ;;  %700 = vmatprep.subr.mxu0 %v359_v44 }
  0xfb   :  { %701 = vmatpush3.msra.mxu0 %v359_v44 }
  0xfc   :  { %v357_v48 = vmax.f32 %v341_v46, 0.0  ;;  %702 = vmatprep.subr.mxu0 %v358_v47 }
  0xfd   :  { %703 = vmatpush3.msra.mxu0 %v358_v47  ;;  %v422_v0 = vpop.permute.xlu1 %421 }
  0xfe   :  { %704 = vmatprep.subr.mxu0 %v357_v48 }
  0xff   :  { %705 = vmatpush3.msra.mxu0 %v357_v48 }
 0x100   :  { %707 = vmatmul.mubr.f32.vlgmr.msra.gmra.mxu0 %v374_v56 }
 0x101   :  { %709 = vmatprep.mubr.f32.mxu0 %v375_v58  ;;  %v412_v5 = vpop.permute.xlu1 %411 }
 0x104   :  { %710 = vmatmul.mubr.f32.gmra.mxu0 %v376_v60 }
 0x105   :  { %712 = vmatprep.mubr.f32.mxu0 %v377_v49  ;;  %v402_v15 = vpop.permute.xlu1 %401 }
 0x108   :  { %713 = vmatmul.mubr.f32.gmra.mxu0 %v378_v50 }
 0x109   :  { %715 = vmatprep.mubr.f32.mxu0 %v379_v51  ;;  %v392_v21 = vpop.permute.xlu1 %391 }
 0x10c   :  { %716 = vmatmul.mubr.f32.gmra.mxu0 %v380_v53 }
 0x1c0   :  { %v708_v59 = vpop.f32.mrf.mxu0 }
 0x1c1   :  { %v501_v20 = vadd.f32 %v708_v59, %v397_v19 }
 0x1c2   :  { %v495_v61 = vpop.f32.mrf.mxu0 }
 0x1c3   :  { %v496_v22 = vadd.f32 %v495_v61, %v392_v21  ;;  %v535_v24 = vmax.f32 %v501_v20, 0.0 }
 0x1c4   :  { %v711_v63 = vpop.f32.mrf.mxu0 }
 0x1c5   :  { %v511_v16 = vadd.f32 %v711_v63, %v407_v12  ;;  %v534_v25 = vmax.f32 %v496_v22, 0.0 }
 0x1c6   :  { %v505_v1 = vpop.f32.mrf.mxu0 }
 0x1c7   :  { %v506_v54 = vadd.f32 %v505_v1, %v402_v15  ;;  %v537_v52 = vmax.f32 %v511_v16, 0.0 }
 0x1c8   :  { %v714_v2 = vpop.f32.mrf.mxu0 }
 0x1c9   :  { %v521_v9 = vadd.f32 %v714_v2, %v417_v3  ;;  %v536_v23 = vmax.f32 %v506_v54, 0.0 }
 0x1ca   :  { %v515_v4 = vpop.f32.mrf.mxu0 }
 0x1cb   :  { %v516_v13 = vadd.f32 %v515_v4, %v412_v5  ;;  %v539_v17 = vmax.f32 %v521_v9, 0.0 }
 0x1cc   :  { %v717_v6 = vpop.f32.mrf.mxu0 }
 0x1cd   :  { %v531_v7 = vadd.f32 %v717_v6, %v427_v62  ;;  %v538_v18 = vmax.f32 %v516_v13, 0.0 }
 0x1ce   :  { %v525_v8 = vpop.f32.mrf.mxu0 }
 0x1cf   :  { %v541_v10 = vmax.f32 %v531_v7, 0.0  ;;  %v526_v11 = vadd.f32 %v525_v8, %v422_v0 }
 0x1d1   :  { %v540_v14 = vmax.f32 %v526_v11, 0.0  ;;  %719 = vmatpush3.msra.mxu1 %v541_v10 }
 0x1d2   :  { %720 = vmatprep.subr.mxu1 %v785_v55 }
 0x1d3   :  { %721 = vmatpush3.msra.mxu1 %v540_v14 }
 0x1d4   :  { %722 = vmatprep.subr.mxu1 %v785_v55 }
 0x1d5   :  { %723 = vmatpush3.msra.mxu1 %v539_v17 }
 0x1d6   :  { %724 = vmatprep.subr.mxu1 %v785_v55 }
 0x1d7   :  { %725 = vmatpush3.msra.mxu1 %v538_v18 }
 0x1d8   :  { %726 = vmatprep.subr.mxu1 %v785_v55 }
 0x1d9   :  { %727 = vmatpush3.msra.mxu1 %v537_v52 }
 0x1da   :  { %728 = vmatprep.subr.mxu1 %v785_v55 }
 0x1db   :  { %729 = vmatpush3.msra.mxu1 %v536_v23 }
 0x1dc   :  { %730 = vmatprep.subr.mxu1 %v785_v55 }
 0x1dd   :  { %731 = vmatpush3.msra.mxu1 %v535_v24 }
 0x1de   :  { %732 = vmatprep.subr.mxu1 %v785_v55 }
 0x1df   :  { %733 = vmatpush3.msra.mxu1 %v534_v25 }
 0x1e0   :  { %735 = vmatmul.mubr.msk.f32.vlgmr.msra.gmra.mxu1 %vm549_vm1, %v542_v26 }
 0x2a0   :  { %v619_v28 = vpop.f32.mrf.mxu1 }
 0x2a1   :  { %v620_v29 = vadd.f32 %v619_v28, %v547_v27 }
 0x2a2   :  { %v736_v30 = vpop.f32.mrf.mxu1 }
 0x2a3   :  { %623 = vst [vmem:[#allocation2] sm:$0xff] %v620_v29 }
 0x2a4   :  { %772 = shalt.err (!%p769_p4)
}
 0x2a5   :  { %633 = dma.vmem_to_hbm [thread:$0]  %s631_s29, 128, %s1069_s7, [#allocation3]  }
 0x2a6   :  { %781 = dma.done.wait [#allocation3], 128  }
 0x2a7   :  { %782 = vsyncadd [#allocation3], 4294967168 }
 0x2a8   :  { %637 = vsyncpa [#allocation3], 1 }

</bundles_post_ra>
